<compile_context>
chip_gen: v6e
topology: v6e:2x2x1
jax: 0.10.0
libtpu: 0.0.40
codegen_flags: <defaults>
</compile_context>

<pallas_src>
import functools
import math

import jax
import jax.numpy as jnp
from jax.experimental import pallas as pl
from jax.experimental.pallas import tpu as pltpu

_INV_SQRT2 = 1.0 / math.sqrt(2.0)
# Abramowitz & Stegun 7.1.26 erf approximation (|err| <= 1.5e-7).
_P = 0.3275911
_A1, _A2, _A3, _A4, _A5 = (0.254829592, -0.284496736, 1.421413741,
                           -1.453152027, 1.061405429)


def _exact_gelu(x):
    """0.5*x*(1+erf(x/sqrt(2))), exp on the EUP, no sign/select needed."""
    ax = jnp.abs(x)
    az = ax * _INV_SQRT2
    t = 1.0 / (1.0 + _P * az)
    poly = t * (_A1 + t * (_A2 + t * (_A3 + t * (_A4 + t * _A5))))
    q = poly * jnp.exp(-az * az)          # exp -> EUP (free slot)
    # x*erf(x/sqrt(2)) == |x|*(1 - q) because erf is odd.
    return 0.5 * (x + ax * (1.0 - q))


def _seg_sums(v, s_bf16):
    """Per-lane sum over that lane's segment, via the (otherwise idle) MXU.

    v: (rows, L) f32;  s_bf16: (L, L) bf16 block-diagonal 0/1 segment matrix.
    A bf16 hi/lo split keeps the result exact to ~f32 precision (the 0/1
    matrix is exact in bf16, products are exact, accumulation is f32).
    """
    hi = v.astype(jnp.bfloat16)
    lo = (v - hi.astype(jnp.float32)).astype(jnp.bfloat16)
    return (jnp.dot(hi, s_bf16, preferred_element_type=jnp.float32)
            + jnp.dot(lo, s_bf16, preferred_element_type=jnp.float32))


def _trans_kernel(*refs, eps, aff, drop, dropout_mode, seg_d, n_seg):
    # dropout_mode: 0 = no dropout, 1 = TPU hardware PRNG (seed prefetched),
    #               2 = host-generated uint32 bits input (interpret-safe).
    refs = list(refs)
    seed_ref = refs.pop(0) if dropout_mode == 1 else None
    x_ref = refs.pop(0)
    bits_ref = refs.pop(0) if dropout_mode == 2 else None
    s_ref = refs.pop(0) if n_seg > 1 else None
    if aff:
        w_ref = refs.pop(0)
        b_ref = refs.pop(0)
    o_ref = refs.pop(0)

    x = x_ref[...].astype(jnp.float32)                 # (br, L)

    # --- LayerNorm over each length-`seg_d` segment (biased variance) -------
    inv_d = 1.0 / float(seg_d)
    if n_seg > 1:
        s_bf16 = s_ref[...]
        mean = _seg_sums(x, s_bf16) * inv_d
        c = x - mean
        var = _seg_sums(c * c, s_bf16) * inv_d
    else:
        mean = jnp.mean(x, axis=-1, keepdims=True)
        c = x - mean
        var = jnp.mean(c * c, axis=-1, keepdims=True)
    xhat = c * jax.lax.rsqrt(var + eps)
    if aff:
        xhat = (xhat * w_ref[...].astype(jnp.float32)
                + b_ref[...].astype(jnp.float32))

    # --- exact GELU ----------------------------------------------------------
    y = _exact_gelu(xhat)

    # --- inverted dropout (training mode) ------------------------------------
    if dropout_mode:
        if dropout_mode == 1:
            pltpu.prng_seed(seed_ref[0] + pl.program_id(0))
            bits = pltpu.prng_random_bits(y.shape)
            if bits.dtype != jnp.uint32:
                bits = pltpu.bitcast(bits, jnp.uint32)
        else:
            bits = bits_ref[...]
        thresh = jnp.uint32(min(int(round(drop * (2.0 ** 32))), 2 ** 32 - 1))
        y = jnp.where(bits >= thresh, y * (1.0 / (1.0 - drop)), 0.0)

    o_ref[...] = y.astype(o_ref.dtype)


def trans_forward(x, weight=None, bias=None, *, drop=0.0, eps=1e-5,
                  training=False, seed=0, block_rows=None):
    """Pallas equivalent of Trans.forward: Dropout(GELU(LayerNorm(x)))."""
    aff = weight is not None
    D = x.shape[-1]
    R = x.size // D
    dtype = x.dtype
    itemsize = jnp.dtype(dtype).itemsize

    # Lane packing: fold k rows into the 128-lane dim when D is a small divisor
    # of 128 so tiles / stores are fully lane-dense.  Typical transformer D
    # (multiple of 128) takes the plain path.
    if D < 128 and 128 % D == 0 and R % (128 // D) == 0:
        n_seg = 128 // D
    else:
        n_seg = 1
    L = n_seg * D
    Rp = R // n_seg
    x2 = x.reshape(Rp, L)

    use_dropout = bool(training) and float(drop) > 0.0
    on_tpu = jax.default_backend() == "tpu"
    dropout_mode = 0 if not use_dropout else (1 if on_tpu else 2)

    # --- VMEM-budgeted row tile (~2 MiB / buffer; in + out double-buffered
    # ~= 8 MiB total, inside the 32 MiB scoped limit set below). --------------
    sub = max(8, 32 // itemsize)                 # sublane multiple for dtype
    if block_rows is None:
        br = (2 * 1024 * 1024) // (L * itemsize)
    else:
        br = int(block_rows)
    br = max(br, sub)
    br = (br // sub) * sub
    if br >= Rp:
        if Rp > sub:
            # Split into >= 2 blocks so both TensorCores (v7x) and the DMA
            # pipeline stay busy even when everything would fit in one tile.
            half = -(-Rp // 2)
            br = -(-half // sub) * sub
        else:
            br = Rp                              # tiny input: one full block
    grid = (pl.cdiv(Rp, br),)                    # partial last block is fine

    # --- specs ----------------------------------------------------------------
    in_specs = [pl.BlockSpec((br, L), lambda i, *_: (i, 0))]
    args = [x2]
    if dropout_mode == 2:
        bits = jax.random.bits(jax.random.PRNGKey(seed), (Rp, L), jnp.uint32)
        in_specs.append(pl.BlockSpec((br, L), lambda i, *_: (i, 0)))
        args.append(bits)
    if n_seg > 1:
        seg_id = jnp.arange(L, dtype=jnp.int32) // D
        seg_mat = (seg_id[:, None] == seg_id[None, :]).astype(jnp.bfloat16)
        in_specs.append(pl.BlockSpec((L, L), lambda i, *_: (0, 0)))  # resident
        args.append(seg_mat)
    if aff:
        w2 = jnp.tile(weight.reshape(1, D), (1, n_seg))
        b2 = jnp.tile(bias.reshape(1, D), (1, n_seg))
        in_specs += [pl.BlockSpec((1, L), lambda i, *_: (0, 0)),     # resident
                     pl.BlockSpec((1, L), lambda i, *_: (0, 0))]
        args += [w2, b2]
    out_specs = pl.BlockSpec((br, L), lambda i, *_: (i, 0))

    num_prefetch = 1 if dropout_mode == 1 else 0
    prefetch_args = ([jnp.asarray([seed], jnp.int32)]
                     if dropout_mode == 1 else [])

    kernel = functools.partial(
        _trans_kernel, eps=float(eps), aff=aff, drop=float(drop),
        dropout_mode=dropout_mode, seg_d=D, n_seg=n_seg)

    # Advisory hint: this op is HBM-bandwidth-bound; helps XLA overlap neighbours.
    elems = R * D
    cost = pl.CostEstimate(
        flops=30 * elems,
        transcendentals=elems,
        bytes_accessed=2 * elems * itemsize + (2 * D * itemsize if aff else 0))

    out = pl.pallas_call(
        kernel,
        out_shape=jax.ShapeDtypeStruct((Rp, L), dtype),
        grid_spec=pltpu.PrefetchScalarGridSpec(
            num_scalar_prefetch=num_prefetch,
            grid=grid,
            in_specs=in_specs,
            out_specs=out_specs),
        compiler_params=pltpu.CompilerParams(
            dimension_semantics=("parallel",),
            vmem_limit_bytes=32 * 1024 * 1024),
        cost_estimate=cost,
    )(*prefetch_args, *args)

    return out.reshape(x.shape)


def _reference(x, weight, bias, eps=1e-5):
    mean = jnp.mean(x, axis=-1, keepdims=True)
    var = jnp.mean((x - mean) ** 2, axis=-1, keepdims=True)
    xhat = (x - mean) * jax.lax.rsqrt(var + eps) * weight + bias
    return 0.5 * xhat * (1.0 + jax.scipy.special.erf(xhat * _INV_SQRT2))


if __name__ == "__main__":
    # Module config: Trans(drop=0.1, norm_shape=32, act='gelu', aff=True)
    B, S, D = 4, 16, 32
    drop = 0.1

    key = jax.random.PRNGKey(0)
    kx, kw, kb = jax.random.split(key, 3)
    x = jax.random.normal(kx, (B, S, D), jnp.float32)
    weight = 1.0 + 0.1 * jax.random.normal(kw, (D,), jnp.float32)
    bias = 0.1 * jax.random.normal(kb, (D,), jnp.float32)

    # --- eval mode (dropout = identity): lane-packed small-D path ------------
    out = jax.block_until_ready(
        trans_forward(x, weight, bias, drop=drop, training=False))
    ref = _reference(x, weight, bias)
    assert out.shape == x.shape and out.dtype == x.dtype
    err = float(jnp.max(jnp.abs(out - ref)))
    assert err < 5e-5, f"packed-path max err {err}"

    # --- eval mode, wide-D path (no packing, multi-step grid) ----------------
    D2 = 256
    x_w = jax.random.normal(jax.random.PRNGKey(1), (2, 8, D2), jnp.float32)
    w_w = 1.0 + 0.1 * jax.random.normal(jax.random.PRNGKey(2), (D2,), jnp.float32)
    b_w = 0.1 * jax.random.normal(jax.random.PRNGKey(3), (D2,), jnp.float32)
    out_w = jax.block_until_ready(
        trans_forward(x_w, w_w, b_w, drop=drop, training=False))
    err_w = float(jnp.max(jnp.abs(out_w - _reference(x_w, w_w, b_w))))
    assert err_w < 5e-5, f"wide-path max err {err_w}"

    # --- training mode: inverted dropout --------------------------------------
    out_tr = jax.block_until_ready(
        trans_forward(x, weight, bias, drop=drop, training=True, seed=123))
    kept_ok = jnp.isclose(out_tr, ref / (1.0 - drop), atol=5e-5)
    dropped = out_tr == 0.0
    assert bool(jnp.all(kept_ok | dropped))
    n_drop = int(jnp.sum(dropped))
    assert 0 < n_drop < x.size // 2, n_drop

    print("KERNEL_OK")
</pallas_src>

<mosaic_0001>
module attributes {stable_mosaic.version = 11 : i64} {
  func.func @_trans_kernel(%arg0: i32, %arg1: memref<8x128xf32, #tpu.memory_space<vmem>>, %arg2: memref<128x128xbf16, #tpu.memory_space<vmem>>, %arg3: memref<1x128xf32, #tpu.memory_space<vmem>>, %arg4: memref<1x128xf32, #tpu.memory_space<vmem>>, %arg5: memref<8x128xf32, #tpu.memory_space<vmem>>) attributes {dimension_semantics = [#tpu.dimension_semantics<parallel>], iteration_bounds = array<i64: 2>, scalar_prefetch = 0 : i64, scratch_operands = 0 : i64, tpu.core_type = #tpu.core_type<tc>, window_params = [{transform_indices = @transform_0, window_bounds = array<i64: 8, 128>}, {pipeline_mode = #tpu.pipeline_mode<synchronous>, transform_indices = @transform_1, window_bounds = array<i64: 128, 128>}, {pipeline_mode = #tpu.pipeline_mode<synchronous>, transform_indices = @transform_2, window_bounds = array<i64: 1, 128>}, {pipeline_mode = #tpu.pipeline_mode<synchronous>, transform_indices = @transform_3, window_bounds = array<i64: 1, 128>}, {transform_indices = @transform_4, window_bounds = array<i64: 8, 128>}]} {
    %c0 = arith.constant 0 : index
    %c0_0 = arith.constant 0 : index
    %0 = vector.load %arg1[%c0, %c0_0] : memref<8x128xf32, #tpu.memory_space<vmem>>, vector<8x128xf32>
    %c0_1 = arith.constant 0 : index
    %c0_2 = arith.constant 0 : index
    %1 = vector.load %arg2[%c0_1, %c0_2] : memref<128x128xbf16, #tpu.memory_space<vmem>>, vector<128x128xbf16>
    %2 = arith.truncf %0 : vector<8x128xf32> to vector<8x128xbf16>
    %3 = arith.extf %2 : vector<8x128xbf16> to vector<8x128xf32>
    %4 = arith.subf %0, %3 : vector<8x128xf32>
    %5 = arith.truncf %4 : vector<8x128xf32> to vector<8x128xbf16>
    %cst = arith.constant dense<0.000000e+00> : vector<8x128xf32>
    %6 = tpu.matmul %2, %1, %cst {dimension_numbers = #tpu.dot_dimension_numbers<[1], [0], [0], [1], [0, 0, 1, 1], [], []>} : vector<8x128xbf16>, vector<128x128xbf16>, vector<8x128xf32> -> vector<8x128xf32>
    %cst_3 = arith.constant dense<0.000000e+00> : vector<8x128xf32>
    %7 = tpu.matmul %5, %1, %cst_3 {dimension_numbers = #tpu.dot_dimension_numbers<[1], [0], [0], [1], [0, 0, 1, 1], [], []>} : vector<8x128xbf16>, vector<128x128xbf16>, vector<8x128xf32> -> vector<8x128xf32>
    %8 = arith.addf %6, %7 : vector<8x128xf32>
    %cst_4 = arith.constant 3.125000e-02 : f32
    %9 = vector.broadcast %cst_4 : f32 to vector<8x128xf32>
    %10 = arith.mulf %8, %9 : vector<8x128xf32>
    %11 = arith.subf %0, %10 : vector<8x128xf32>
    %12 = arith.mulf %11, %11 : vector<8x128xf32>
    %13 = arith.truncf %12 : vector<8x128xf32> to vector<8x128xbf16>
    %14 = arith.extf %13 : vector<8x128xbf16> to vector<8x128xf32>
    %15 = arith.subf %12, %14 : vector<8x128xf32>
    %16 = arith.truncf %15 : vector<8x128xf32> to vector<8x128xbf16>
    %cst_5 = arith.constant dense<0.000000e+00> : vector<8x128xf32>
    %17 = tpu.matmul %13, %1, %cst_5 {dimension_numbers = #tpu.dot_dimension_numbers<[1], [0], [0], [1], [0, 0, 1, 1], [], []>} : vector<8x128xbf16>, vector<128x128xbf16>, vector<8x128xf32> -> vector<8x128xf32>
    %cst_6 = arith.constant dense<0.000000e+00> : vector<8x128xf32>
    %18 = tpu.matmul %16, %1, %cst_6 {dimension_numbers = #tpu.dot_dimension_numbers<[1], [0], [0], [1], [0, 0, 1, 1], [], []>} : vector<8x128xbf16>, vector<128x128xbf16>, vector<8x128xf32> -> vector<8x128xf32>
    %19 = arith.addf %17, %18 : vector<8x128xf32>
    %cst_7 = arith.constant 3.125000e-02 : f32
    %20 = vector.broadcast %cst_7 : f32 to vector<8x128xf32>
    %21 = arith.mulf %19, %20 : vector<8x128xf32>
    %cst_8 = arith.constant 9.99999974E-6 : f32
    %22 = vector.broadcast %cst_8 : f32 to vector<8x128xf32>
    %23 = arith.addf %21, %22 : vector<8x128xf32>
    %24 = math.rsqrt %23 : vector<8x128xf32>
    %25 = arith.mulf %11, %24 : vector<8x128xf32>
    %c0_9 = arith.constant 0 : index
    %c0_10 = arith.constant 0 : index
    %26 = vector.load %arg3[%c0_9, %c0_10] : memref<1x128xf32, #tpu.memory_space<vmem>>, vector<1x128xf32>
    %27 = vector.broadcast %26 : vector<1x128xf32> to vector<8x128xf32>
    %28 = arith.mulf %25, %27 : vector<8x128xf32>
    %c0_11 = arith.constant 0 : index
    %c0_12 = arith.constant 0 : index
    %29 = vector.load %arg4[%c0_11, %c0_12] : memref<1x128xf32, #tpu.memory_space<vmem>>, vector<1x128xf32>
    %30 = vector.broadcast %29 : vector<1x128xf32> to vector<8x128xf32>
    %31 = arith.addf %28, %30 : vector<8x128xf32>
    %32 = math.absf %31 : vector<8x128xf32>
    %cst_13 = arith.constant 0.707106769 : f32
    %33 = vector.broadcast %cst_13 : f32 to vector<8x128xf32>
    %34 = arith.mulf %32, %33 : vector<8x128xf32>
    %cst_14 = arith.constant 0.327591091 : f32
    %35 = vector.broadcast %cst_14 : f32 to vector<8x128xf32>
    %36 = arith.mulf %35, %34 : vector<8x128xf32>
    %cst_15 = arith.constant 1.000000e+00 : f32
    %37 = vector.broadcast %cst_15 : f32 to vector<8x128xf32>
    %38 = arith.addf %37, %36 : vector<8x128xf32>
    %cst_16 = arith.constant 1.000000e+00 : f32
    %39 = vector.broadcast %cst_16 : f32 to vector<8x128xf32>
    %40 = arith.divf %39, %38 : vector<8x128xf32>
    %cst_17 = arith.constant 1.06140542 : f32
    %41 = vector.broadcast %cst_17 : f32 to vector<8x128xf32>
    %42 = arith.mulf %40, %41 : vector<8x128xf32>
    %cst_18 = arith.constant -1.45315206 : f32
    %43 = vector.broadcast %cst_18 : f32 to vector<8x128xf32>
    %44 = arith.addf %43, %42 : vector<8x128xf32>
    %45 = arith.mulf %40, %44 : vector<8x128xf32>
    %cst_19 = arith.constant 1.42141378 : f32
    %46 = vector.broadcast %cst_19 : f32 to vector<8x128xf32>
    %47 = arith.addf %46, %45 : vector<8x128xf32>
    %48 = arith.mulf %40, %47 : vector<8x128xf32>
    %cst_20 = arith.constant -0.284496725 : f32
    %49 = vector.broadcast %cst_20 : f32 to vector<8x128xf32>
    %50 = arith.addf %49, %48 : vector<8x128xf32>
    %51 = arith.mulf %40, %50 : vector<8x128xf32>
    %cst_21 = arith.constant 0.254829586 : f32
    %52 = vector.broadcast %cst_21 : f32 to vector<8x128xf32>
    %53 = arith.addf %52, %51 : vector<8x128xf32>
    %54 = arith.mulf %40, %53 : vector<8x128xf32>
    %cst_22 = arith.constant 0.000000e+00 : f32
    %55 = vector.broadcast %cst_22 : f32 to vector<8x128xf32>
    %56 = arith.subf %55, %34 : vector<8x128xf32>
    %57 = arith.mulf %56, %34 : vector<8x128xf32>
    %58 = math.exp %57 : vector<8x128xf32>
    %59 = arith.mulf %54, %58 : vector<8x128xf32>
    %cst_23 = arith.constant 1.000000e+00 : f32
    %60 = vector.broadcast %cst_23 : f32 to vector<8x128xf32>
    %61 = arith.subf %60, %59 : vector<8x128xf32>
    %62 = arith.mulf %32, %61 : vector<8x128xf32>
    %63 = arith.addf %31, %62 : vector<8x128xf32>
    %cst_24 = arith.constant 5.000000e-01 : f32
    %64 = vector.broadcast %cst_24 : f32 to vector<8x128xf32>
    %65 = arith.mulf %64, %63 : vector<8x128xf32>
    %c0_25 = arith.constant 0 : index
    %c0_26 = arith.constant 0 : index
    %66 = vector.load %arg5[%c0_25, %c0_26] : memref<8x128xf32, #tpu.memory_space<vmem>>, vector<8x128xf32>
    tpu.vector_store %arg5[%c0_25, %c0_26], %65 {strides = array<i32>} : memref<8x128xf32, #tpu.memory_space<vmem>>, vector<8x128xf32>,
    return
  }
  func.func @transform_0(%arg0: i32) -> (i32, i32) {
    %c0_i32 = arith.constant 0 : i32
    %c0_i32_0 = arith.constant 0 : i32
    return %arg0, %c0_i32 : i32, i32
  }
  func.func @transform_1(%arg0: i32) -> (i32, i32) {
    %c0_i32 = arith.constant 0 : i32
    %c0_i32_0 = arith.constant 0 : i32
    %c0_i32_1 = arith.constant 0 : i32
    return %c0_i32, %c0_i32_0 : i32, i32
  }
  func.func @transform_2(%arg0: i32) -> (i32, i32) {
    %c0_i32 = arith.constant 0 : i32
    %c0_i32_0 = arith.constant 0 : i32
    %c0_i32_1 = arith.constant 0 : i32
    return %c0_i32, %c0_i32_0 : i32, i32
  }
  func.func @transform_3(%arg0: i32) -> (i32, i32) {
    %c0_i32 = arith.constant 0 : i32
    %c0_i32_0 = arith.constant 0 : i32
    %c0_i32_1 = arith.constant 0 : i32
    return %c0_i32, %c0_i32_0 : i32, i32
  }
  func.func @transform_4(%arg0: i32) -> (i32, i32) {
    %c0_i32 = arith.constant 0 : i32
    %c0_i32_0 = arith.constant 0 : i32
    return %arg0, %c0_i32 : i32, i32
  }
}

</mosaic_0001>

<bundles_post_ra>
// kernel: tpu_custom_call.1
= control target key start
LH: loop header
LB: loop body
LE: loop exit
PB: predicated region body
PF: predicated region fallthrough
CT: control target
= control target key end

     0   :  { %9 = vsyncpa [#allocation3], 0  ;;  %s1185_s0 = inlined_call_operand.hbm [shape: f32[16,128], index: 0, kind: input, shape index: {}]   ;;  %s1186_s1 = inlined_call_operand.hbm [shape: bf16[128,128], index: 1, kind: input, shape index: {}]   ;;  %s1187_s2 = inlined_call_operand.vmem [shape: f32[1,128], index: 2, kind: input, shape index: {}]   ;;  %s1188_s3 = inlined_call_operand.vmem [shape: f32[1,128], index: 3, kind: input, shape index: {}]   ;;  %s1189_s4 = inlined_call_operand.hbm [shape: f32[16,128], index: 4, kind: output, shape index: {}]  }
   0x1   :  { %11 = vsyncpa [#allocation3 + $0x1], 0 }
   0x2   :  { %12 = vsyncpa [#allocation6], 0 }
   0x3   :  { %13 = vsyncpa [#allocation4], 0 }
   0x4   :  { %15 = vsyncpa [#allocation4 + $0x1], 0  ;;  %s975_s15 = smov 0   ;;  %s977_s16 = smov 0  }
   0x5   :  { %s979_s17 = smov 0   ;;  %s981_s18 = smov 0  }
   0x6 LB: > { %s996_s19 = sadd.s32 4294967295, %s941_s18   ;;  %s604_s20 = sadd.s32 4294967294, %s941_s18   ;;  %s941_s18 = sphi %s981_s18, %s1211_s18   ;;  %s937_s17 = sphi %s979_s17, %s1210_s17   ;;  %s933_s16 = sphi %s977_s16, %s1209_s16   ;;  %s929_s15 = sphi %s975_s15, %s1208_s15  }
   0x7   : > { %p41_p0 = scmp.ne.s32.totalorder %s933_s16, %s929_s15  ;;  %p1190_p1 = scmp.eq.s32.totalorder %s996_s19, 0 }
   0x8   : > { %p134_p3 = scmp.eq.s32.totalorder %s604_s20, 1  ;;  %p605_p5 = scmp.ge.s32.totalorder %s941_s18, 1 }
   0x9   : > { %p1005_p4 = por %p1190_p1, %p41_p0  ;;  %p141_p7 = scmp.lt.s32.totalorder %s941_s18, 3 }
   0xa   : > { %p1010_p6 = por %p134_p3, %p41_p0  ;;  %s943_s24 = smov [#allocation5]  }
   0xb   : > { %s1194_s21 = scalar_select %p1005_p4, 1, 0 }
   0xc   : > { %s1195_s22 = scalar_select %p1010_p6, 1, 0 }
   0xd   : > { %p1015_p8 = pnand %p605_p5, %p141_p7  ;;  %s153_s25 = sshll.u32 %s943_s24, 4  ;;  %s154_s25 = int_to_ptr.vmem [resolvable:$true] %s153_s25 }
   0xe   : > { %s1029_s27 = sadd.s32 1, %s941_s18   ;;  %s28_s28 = sadd.s32 1, %s937_s17 }
   0xf   : > { %s1196_s23 = scalar_select %p1015_p8, 1, 0 }
  0x10   : > { %p752_p9 = pneg %p1015_p8  ;;  %s25_s29 = ssub.s32 %s941_s18, %s1029_s27 }
  0x11   : > { %s830_s30 = scalar_lea.vmem %s154_s25, 1024  ;;  %p838_p5 = scmp.lt.s32.totalorder %s154_s25, %s154_s25 }
  0x12   : > { %p1024_p11 = pnand %p752_p9, %p1190_p1  ;;  %p831_p13 = scmp.ne.s32.totalorder %s154_s25, %s830_s30 }
  0x13   : > { %p839_p7 = scmp.lt.s32.totalorder %s830_s30, %s830_s30 }
  0x14   : > { %p821_p12 = pneg %p1024_p11 }
  0x15   : > { %p840_p10 = por %p839_p7, %p838_p5 }
  0x16   : > { %p833_p0 = pnand %p831_p13, %p821_p12 }
  0x18   : > { %p834_p3 = pneg %p833_p0 }
  0x1a   : > { %p841_p2 = pnand %p840_p10, %p834_p3 }
  0x1c   : > { %844 = shalt.err (!%p841_p2)
}
  0x1d   : > { %s944_s5 = smov 64   ;;  %s945_s6 = smov 4  }
  0x1e   : > { %755 = dma.hbm_to_vmem [thread:$0]  (!%p1024_p11), %s1186_s1, 1024, %s154_s25, [#allocation6], %s944_s5, %s944_s5, %s945_s6  }
  0x1f   : > { %p26_p9 = scmp.eq.s32.totalorder %s25_s29, 0  ;;  %p35_p12 = scmp.ne.s32.totalorder %s937_s17, %s933_s16 }
  0x20   : > { %p36_p10 = scmp.eq.s32.totalorder %s941_s18, 0  ;;  %p765_p2 = scmp.lt.s32.totalorder %s941_s18, 2 }
  0x21   : > { %s1046_s9 = scalar_select %p26_p9, %s937_s17, %s28_s28  }
  0x22   : > { %p37_p13 = por %p36_p10, %p35_p12  ;;  %p1198_p0 = scmp.eq.s32.totalorder %s996_s19, 1 }
  0x23   : > { %s173_s11 = sand.u32 1, %s937_s17   ;;  %s609_s12 = sshll.u32 %s941_s18, 7 }
  0x24   : > { %p1050_p3 = por %p1198_p0, %p35_p12  ;;  %s608_s13 = sshll.u32 %s173_s11, 3 }
  0x25   : > { %s1059_s24 = scalar_lea.hbm %s1185_s0, %s609_s12  ;;  %s177_s25 = scalar_lea.vmem [#allocation2], %s608_s13 }
  0x26   : > { %s1199_s10 = scalar_select %p1050_p3, 1, 0 }
  0x27   : > { %s184_s26 = sshll.u32 %s177_s25, 4  ;;  %p1061_p11 = pnand %p765_p2, %p37_p13  ;;  %s185_s26 = int_to_ptr.vmem [resolvable:$true] %s184_s26 }
  0x28   : > { %s174_s29 = scalar_lea.sflag [#allocation3], %s173_s11  ;;  %s845_s30 = scalar_lea.hbm %s1059_s24, 128 }
  0x29   : > { %p846_p5 = scmp.ne.s32.totalorder %s1059_s24, %s845_s30  ;;  %p847_p7 = pneg %p1061_p11 }
  0x2a   : > { %s850_s7 = scalar_lea.hbm %s1185_s0, 256  ;;  %p851_p10 = scmp.lt.s32.totalorder %s1059_s24, %s1185_s0 }
  0x2b   : > { %p848_p9 = pnand %p847_p7, %p846_p5  ;;  %p852_p2 = scmp.lt.s32.totalorder %s850_s7, %s845_s30 }
  0x2d   : > { %p849_p12 = pneg %p848_p9  ;;  %p853_p13 = por %p852_p2, %p851_p10 }
  0x2f   : > { %p854_p0 = pnand %p853_p13, %p849_p12 }
  0x31   : > { %857 = shalt.err (!%p854_p0)
}
  0x32   : > { %s858_s13 = scalar_lea.vmem %s185_s26, 128  ;;  %s946_s11 = smov [#allocation2]  }
  0x33   : > { %p859_p1 = scmp.ne.s32.totalorder %s185_s26, %s858_s13  ;;  %s863_s14 = sshll.u32 %s946_s11, 4  ;;  %s864_s14 = int_to_ptr.vmem [resolvable:$false] %s863_s14 }
  0x34   : > { %s865_s20 = scalar_lea.vmem %s864_s14, 256  ;;  %p866_p5 = scmp.lt.s32.totalorder %s185_s26, %s864_s14 }
  0x35   : > { %p861_p6 = pnand %p859_p1, %p847_p7  ;;  %p867_p9 = scmp.lt.s32.totalorder %s865_s20, %s858_s13 }
  0x37   : > { %p862_p3 = pneg %p861_p6  ;;  %p868_p4 = por %p867_p9, %p866_p5 }
  0x39   : > { %p869_p8 = pnand %p868_p4, %p862_p3 }
  0x3b   : > { %872 = shalt.err (!%p869_p8)
}
  0x3c   : > { %759 = dma.hbm_to_vmem [thread:$0]  (!%p1061_p11), %s1059_s24, 128, %s185_s26, %s174_s29  }
  0x3d   : > { %p1201_p12 = scmp.ne.s32.totalorder %s1196_s23, 0 }
  0x3e   : > { %s1082_s25 = sand.u32 (!%p1201_p12), 1, %s933_s16   ;;  %p1202_p1 = scmp.ne.s32.totalorder (!%p1201_p12), %s1194_s21, 0 }
  0x3f   : > { %193 = sbr.rel (%p1201_p12) target bundleno = 597 (0x255), region = 36  ;;  %s611_s30 = sshll.u32 (!%p1201_p12), %s1082_s25, 3 }
  0x40   : > { %s196_s5 = scalar_lea.sflag (!%p1201_p12), [#allocation3], %s1082_s25  ;;  %s199_s6 = scalar_lea.vmem (!%p1201_p12), [#allocation2], %s611_s30 }
  0x44   : > { %916 = dma.done.wait (%p1202_p1), %s196_s5, 128  }
  0x45   : > { %918 = vsyncadd (%p1202_p1), %s196_s5, 4294967168  ;;  %p1203_p4 = scmp.eq.s32.totalorder %s996_s19, 0 }
  0x47   : > { %920 = dma.done.wait (%p1203_p4), [#allocation6], 1024   ;;  %p1204_p6 = pmov %p1203_p4 }
  0x48   : > { %v947_v0 = vmov 0.0   ;;  %vm948_vm0 = vmmov 0   ;;  %v805_v1 = vld [vmem:[#allocation5 + $0x38] sm:$0xff]   ;;  %v806_v2 = vld [vmem:[#allocation5 + $0x30] sm:$0xff]   ;;  %v807_v3 = vld [vmem:[#allocation5 + $0x28] sm:$0xff]   ;;  %s625_s28 = sshll.u32 %s996_s19, 7 }
  0x49   : > { %922 = vsyncadd (%p1204_p6), [#allocation6], 4294966272  ;;  %664 = vmatprep.subr.bf16.mxu0 %v947_v0  ;;  %684 = vmatprep.subr.bf16.mxu1 %v947_v0  ;;  %v808_v4 = vld [vmem:[#allocation5 + $0x20] sm:$0xff]   ;;  %v809_v5 = vld [vmem:[#allocation5 + $0x18] sm:$0xff]   ;;  %s227_s29 = scalar_lea.vmem [#allocation7], %s611_s30  ;;  %s522_s13 = scalar_lea.hbm %s1189_s4, %s625_s28 }
  0x4a   : > { %680 = vmatprep.mubr.msk.bf16.mxu0 %vm948_vm0, %v947_v0  ;;  %700 = vmatprep.mubr.msk.bf16.mxu1 %vm948_vm0, %v947_v0  ;;  %v1108_v6 = vld [vmem:[%s199_s6] sm:$0xff]  ;;  %v811_v10 = vld [vmem:[#allocation5 + $0x8] sm:$0xff]   ;;  %v812_v12 = vld [vmem:[#allocation5] sm:$0xff]   ;;  %s524_s7 = sshll.u32 %s227_s29, 4  ;;  %s511_s11 = scalar_lea.sflag [#allocation4], %s1082_s25  ;;  %s525_s7 = int_to_ptr.vmem [resolvable:$true] %s524_s7 }
  0x4b   : > { %665 = vmatpush3.bf16.msra.mxu0 %v805_v1  ;;  %685 = vmatpush3.bf16.msra.mxu1 %v805_v1  ;;  %v246_v7 = vpack.c.bf16 %v1108_v6, %v1108_v6  ;;  %v810_v8 = vld [vmem:[#allocation5 + $0x10] sm:$0xff]   ;;  %s873_s14 = scalar_lea.vmem %s525_s7, 128  ;;  %p1205_p3 = scmp.ne.s32.totalorder %s1199_s10, 0 }
  0x4c   : > { %666 = vmatprep.subr.bf16.mxu0 %v947_v0  ;;  %686 = vmatprep.subr.bf16.mxu1 %v947_v0  ;;  %v622_v42 = vld [vmem:[%s1187_s2] ss:$0 sm:$0xff]  ;;  %p874_p8 = scmp.ne.s32.totalorder %s525_s7, %s873_s14  ;;  %s949_s20 = smov [#allocation7]  }
  0x4d   : > { %v247_v9 = vunpack.c.l.bf16 %v246_v7  ;;  %v623_v44 = vld [vmem:[%s1188_s3] ss:$0 sm:$0xff]  ;;  %s877_s5 = sshll.u32 %s949_s20, 4  ;;  %s878_s5 = int_to_ptr.vmem [resolvable:$false] %s877_s5 }
  0x4e   : > { %p875_p11 = pnand %p874_p8, %p1205_p3  ;;  %s879_s19 = scalar_lea.vmem %s878_s5, 256 }
  0x4f   : > { %667 = vmatpush3.bf16.msra.mxu0 %v806_v2  ;;  %687 = vmatpush3.bf16.msra.mxu1 %v806_v2  ;;  %v248_v11 = vsub.f32 %v1108_v6, %v247_v9  ;;  %p880_p10 = scmp.lt.s32.totalorder %s525_s7, %s878_s5  ;;  %p881_p2 = scmp.lt.s32.totalorder %s879_s19, %s873_s14 }
  0x50   : > { %668 = vmatprep.subr.bf16.mxu0 %v947_v0  ;;  %688 = vmatprep.subr.bf16.mxu1 %v947_v0  ;;  %p876_p7 = pneg %p875_p11 }
  0x51   : > { %v249_v13 = vpack.c.bf16 %v248_v11, %v248_v11  ;;  %p882_p13 = por %p881_p2, %p880_p10 }
  0x53   : > { %669 = vmatpush3.bf16.msra.mxu0 %v807_v3  ;;  %689 = vmatpush3.bf16.msra.mxu1 %v807_v3  ;;  %p883_p0 = pnand %p882_p13, %p876_p7 }
  0x54   : > { %670 = vmatprep.subr.bf16.mxu0 %v947_v0  ;;  %690 = vmatprep.subr.bf16.mxu1 %v947_v0 }
  0x57   : > { %671 = vmatpush3.bf16.msra.mxu0 %v808_v4  ;;  %691 = vmatpush3.bf16.msra.mxu1 %v808_v4 }
  0x58   : > { %672 = vmatprep.subr.bf16.mxu0 %v947_v0  ;;  %692 = vmatprep.subr.bf16.mxu1 %v947_v0 }
  0x5b   : > { %673 = vmatpush3.bf16.msra.mxu0 %v809_v5  ;;  %693 = vmatpush3.bf16.msra.mxu1 %v809_v5 }
  0x5c   : > { %674 = vmatprep.subr.bf16.mxu0 %v947_v0  ;;  %694 = vmatprep.subr.bf16.mxu1 %v947_v0 }
  0x5f   : > { %675 = vmatpush3.bf16.msra.mxu0 %v810_v8  ;;  %695 = vmatpush3.bf16.msra.mxu1 %v810_v8 }
  0x60   : > { %676 = vmatprep.subr.bf16.mxu0 %v947_v0  ;;  %696 = vmatprep.subr.bf16.mxu1 %v947_v0 }
  0x63   : > { %677 = vmatpush3.bf16.msra.mxu0 %v811_v10  ;;  %697 = vmatpush3.bf16.msra.mxu1 %v811_v10 }
  0x64   : > { %678 = vmatprep.subr.bf16.mxu0 %v947_v0  ;;  %698 = vmatprep.subr.bf16.mxu1 %v947_v0 }
  0x67   : > { %679 = vmatpush3.bf16.msra.mxu0 %v812_v12  ;;  %699 = vmatpush3.bf16.msra.mxu1 %v812_v12 }
  0x68   : > { %724 = vmatprep.subr.bf16.mxu1 %v947_v0  ;;  %704 = vmatprep.subr.bf16.mxu0 %v947_v0 }
  0x6a   : > { %681 = vmatmul.mubr.bf16.vlgmr.msra.gmra.mxu0 %v249_v13  ;;  %701 = vmatmul.mubr.bf16.vlgmr.msra.gmra.mxu1 %v246_v7 }
  0x6b   : > { %725 = vmatpush3.bf16.msra.mxu1 %v805_v1  ;;  %705 = vmatpush3.bf16.msra.mxu0 %v805_v1 }
  0x6c   : > { %726 = vmatprep.subr.bf16.mxu1 %v947_v0  ;;  %706 = vmatprep.subr.bf16.mxu0 %v947_v0 }
  0x6d   : > { %740 = vmatprep.mubr.msk.bf16.mxu1 %vm948_vm0, %v947_v0  ;;  %720 = vmatprep.mubr.msk.bf16.mxu0 %vm948_vm0, %v947_v0 }
  0x6f   : > { %727 = vmatpush3.bf16.msra.mxu1 %v806_v2  ;;  %707 = vmatpush3.bf16.msra.mxu0 %v806_v2 }
  0x70   : > { %728 = vmatprep.subr.bf16.mxu1 %v947_v0  ;;  %708 = vmatprep.subr.bf16.mxu0 %v947_v0 }
  0x73   : > { %729 = vmatpush3.bf16.msra.mxu1 %v807_v3  ;;  %709 = vmatpush3.bf16.msra.mxu0 %v807_v3 }
  0x74   : > { %730 = vmatprep.subr.bf16.mxu1 %v947_v0  ;;  %710 = vmatprep.subr.bf16.mxu0 %v947_v0 }
  0x77   : > { %731 = vmatpush3.bf16.msra.mxu1 %v808_v4  ;;  %711 = vmatpush3.bf16.msra.mxu0 %v808_v4 }
  0x78   : > { %732 = vmatprep.subr.bf16.mxu1 %v947_v0  ;;  %712 = vmatprep.subr.bf16.mxu0 %v947_v0 }
  0x7b   : > { %733 = vmatpush3.bf16.msra.mxu1 %v809_v5  ;;  %713 = vmatpush3.bf16.msra.mxu0 %v809_v5 }
  0x7c   : > { %734 = vmatprep.subr.bf16.mxu1 %v947_v0  ;;  %714 = vmatprep.subr.bf16.mxu0 %v947_v0 }
  0x7f   : > { %735 = vmatpush3.bf16.msra.mxu1 %v810_v8  ;;  %715 = vmatpush3.bf16.msra.mxu0 %v810_v8 }
  0x80   : > { %736 = vmatprep.subr.bf16.mxu1 %v947_v0  ;;  %716 = vmatprep.subr.bf16.mxu0 %v947_v0 }
  0x83   : > { %737 = vmatpush3.bf16.msra.mxu1 %v811_v10  ;;  %717 = vmatpush3.bf16.msra.mxu0 %v811_v10 }
  0x84   : > { %738 = vmatprep.subr.bf16.mxu1 %v947_v0  ;;  %718 = vmatprep.subr.bf16.mxu0 %v947_v0 }
  0x87   : > { %739 = vmatpush3.bf16.msra.mxu1 %v812_v12  ;;  %719 = vmatpush3.bf16.msra.mxu0 %v812_v12 }
 0x12a   : > { %v332_v14 = vpop.f32.mrf.mxu0  ;;  %v372_v15 = vpop.f32.mrf.mxu1 }
 0x12b   : > { %v373_v16 = vadd.f32 %v372_v15, %v332_v14 }
 0x12c   : > { %v682_v17 = vpop.f32.mrf.mxu0  ;;  %v702_v18 = vpop.f32.mrf.mxu1 }
 0x12d   : > { %v378_v19 = vmul.f32 0.03125, %v373_v16 }
 0x12e   : > { %v335_v20 = vpop.f32.mrf.mxu0  ;;  %v375_v21 = vpop.f32.mrf.mxu1 }
 0x12f   : > { %v379_v22 = vsub.f32 %v1108_v6, %v378_v19 }
 0x130   : > { %v683_v23 = vpop.f32.mrf.mxu0  ;;  %v703_v24 = vpop.f32.mrf.mxu1 }
 0x131   : > { %v380_v25 = vmul.f32 %v379_v22, %v379_v22 }
 0x133   : > { %v381_v26 = vpack.c.bf16 %v380_v25, %v380_v25 }
 0x135   : > { %v382_v27 = vunpack.c.l.bf16 %v381_v26  ;;  %741 = vmatmul.mubr.bf16.vlgmr.msra.gmra.mxu1 %v381_v26 }
 0x137   : > { %v383_v28 = vsub.f32 %v380_v25, %v382_v27 }
 0x139   : > { %v384_v29 = vpack.c.bf16 %v383_v28, %v383_v28 }
 0x13b   : > { %721 = vmatmul.mubr.bf16.vlgmr.msra.gmra.mxu0 %v384_v29 }
 0x1f5   : > { %v459_v30 = vpop.f32.mrf.mxu1 }
 0x1f7   : > { %v742_v31 = vpop.f32.mrf.mxu1 }
 0x1f9   : > { %v462_v32 = vpop.f32.mrf.mxu1 }
 0x1fb   : > { %v419_v33 = vpop.f32.mrf.mxu0  ;;  %v743_v34 = vpop.f32.mrf.mxu1 }
 0x1fc   : > { %v460_v35 = vadd.f32 %v459_v30, %v419_v33 }
 0x1fd   : > { %v722_v36 = vpop.f32.mrf.mxu0 }
 0x1fe   : > { %v465_v37 = vmul.f32 0.03125, %v460_v35 }
 0x1ff   : > { %v422_v38 = vpop.f32.mrf.mxu0 }
 0x200   : > { %v466_v39 = vadd.f32 1e-05, %v465_v37 }
 0x201   : > { %v723_v40 = vpop.f32.mrf.mxu0 }
 0x202   : > { %813 = vrsqrt.f32 %v466_v39 }
 0x20f   : > { %v814_v41 = vpop.eup %813 }
 0x210   : > { %v468_v43 = vmul.f32 %v814_v41, %v379_v22 }
 0x212   : > { %v476_v45 = vmul.f32 %v622_v42, %v468_v43 }
 0x214   : > { %v484_v46 = vadd.f32 %v623_v44, %v476_v45 }
 0x216   : > { %v485_v47 = vand.u32 2147483647, %v484_v46 }
 0x218   : > { %v486_v48 = vmul.f32 0.70710677, %v485_v47 }
 0x21a   : > { %v487_v49 = vmul.f32 0.3275911, %v486_v48  ;;  %v500_v51 = vsub.f32 0.0, %v486_v48 }
 0x21c   : > { %v488_v50 = vadd.f32 1.0, %v487_v49  ;;  %v501_v52 = vmul.f32 %v500_v51, %v486_v48 }
 0x21e   : > { %815 = vrcp.f32 %v488_v50  ;;  %v502_v55 = vmul.f32 1.442695, %v501_v52 }
 0x220   : > { %817 = vpow2.f32 %v502_v55 }
 0x22b   : > { %v816_v53 = vpop.eup %815 }
 0x22c   : > { %v491_v54 = vmul.f32 1.0614054, %v816_v53 }
 0x22d   : > { %v818_v0 = vpop.eup %817 }
 0x22e   : > { %v492_v56 = vadd.f32 -1.4531521, %v491_v54 }
 0x230   : > { %v493_v57 = vmul.f32 %v816_v53, %v492_v56 }
 0x232   : > { %v494_v58 = vadd.f32 1.4214138, %v493_v57 }
 0x234   : > { %v495_v59 = vmul.f32 %v816_v53, %v494_v58 }
 0x236   : > { %v496_v60 = vadd.f32 -0.28449672, %v495_v59 }
 0x238   : > { %v497_v61 = vmul.f32 %v816_v53, %v496_v60 }
 0x23a   : > { %v498_v62 = vadd.f32 0.2548296, %v497_v61 }
 0x23c   : > { %v499_v63 = vmul.f32 %v816_v53, %v498_v62 }
 0x23e   : > { %v504_v1 = vmul.f32 %v818_v0, %v499_v63 }
 0x240   : > { %v505_v2 = vsub.f32 1.0, %v504_v1 }
 0x242   : > { %v506_v3 = vmul.f32 %v505_v2, %v485_v47 }
 0x244   : > { %v507_v4 = vadd.f32 %v506_v3, %v484_v46 }
 0x246   : > { %v508_v5 = vmul.f32 0.5, %v507_v4 }
 0x248   : > { %509 = vst [vmem:[%s227_s29] sm:$0xff] %v508_v5 }
 0x249   : > { %886 = shalt.err (!%p883_p0)
}
 0x24a   : > { %s887_s30 = scalar_lea.hbm %s522_s13, 128  ;;  %s891_s21 = scalar_lea.hbm %s1189_s4, 256 }
 0x24b   : > { %p888_p5 = scmp.ne.s32.totalorder %s522_s13, %s887_s30  ;;  %p892_p1 = scmp.lt.s32.totalorder %s522_s13, %s1189_s4 }
 0x24c   : > { %p893_p4 = scmp.lt.s32.totalorder %s891_s21, %s887_s30 }
 0x24d   : > { %p889_p9 = pnand %p888_p5, %p1205_p3 }
 0x24e   : > { %p894_p6 = por %p893_p4, %p892_p1 }
 0x24f   : > { %p890_p12 = pneg %p889_p9 }
 0x251   : > { %p895_p8 = pnand %p894_p6, %p890_p12 }
 0x253   : > { %898 = shalt.err (!%p895_p8)
}
 0x254   : > { %750 = dma.vmem_to_hbm [thread:$0]  (%p1205_p3), %s525_s7, 128, %s522_s13, %s511_s11  }
 0x255 PF: > { %s536_s26 = sand.u32 1, %s929_s15   ;;  %p1206_p11 = scmp.ne.s32.totalorder %s1195_s22, 0 }
 0x256   : > { %p1207_p7 = scmp.ge.s32.totalorder %s941_s18, 2  ;;  %s537_s28 = scalar_lea.sflag [#allocation4], %s536_s26 }
 0x258   : > { %p761_p10 = pnand %p1207_p7, %p1206_p11 }
 0x25a   : > { %p762_p2 = pneg %p761_p10 }
 0x25c   : > { %924 = dma.done.wait (%p762_p2), %s537_s28, 128  }
 0x25d   : > { %926 = vsyncadd (%p762_p2), %s537_s28, 4294967168  ;;  %p18_p13 = scmp.ge.s32.totalorder %s1029_s27, 4   ;;  %s1208_s15 = smov %s933_s16 }
 0x25e   : > { %s1209_s16 = smov %s937_s17  ;;  %s1210_s17 = smov %s1046_s9 }
 0x25f   : > { %s1211_s18 = smov %s1029_s27  ;;  %20 = sbr.rel (!%p18_p13) target bundleno = 6 (0x6), region = 85 }
 0x264   :  { %542 = vsyncpa [#allocation3], 1 }
 0x265   :  { %544 = vsyncpa [#allocation3 + $0x1], 1 }
 0x266   :  { %545 = vsyncpa [#allocation6], 1 }
 0x267   :  { %546 = vsyncpa [#allocation4], 1 }
 0x268   :  { %548 = vsyncpa [#allocation4 + $0x1], 1 }

</bundles_post_ra>
